<compile_context>
chip_gen: v6e
topology: v6e:2x2x1
jax: 0.10.0
libtpu: 0.0.40
codegen_flags: <defaults>
</compile_context>

<pallas_src>
import functools

import jax
import jax.numpy as jnp
from jax.experimental import pallas as pl
from jax.experimental.pallas import tpu as pltpu

WEIGHT = 5.0     # module default weight
EPS = 1e-6       # F.pairwise_distance eps (added to z - t before |.| -- intentional)

_LANE = 128
_SUBLANE = 8


def _cdiv(a, b):
    return -(-a // b)


def _round_up(x, m):
    return (x + m - 1) // m * m


def _vmem_capacity_bytes():
    """Best-effort physical VMEM query; conservative (v7x-sized) fallback."""
    try:
        info_fn = getattr(pltpu, "get_tpu_info", None)
        if info_fn is not None:
            cap = getattr(info_fn(), "vmem_capacity_bytes", None)
            if cap:
                return int(cap)
    except Exception:
        pass
    return 64 * 1024 * 1024


def _dpl_kernel(z_ref, t_ref, out_ref, acc_ref, *, tb, d, b_true):
    i = pl.program_id(0)

    @pl.when(i == 0)
    def _init():
        acc_ref[...] = jnp.zeros_like(acc_ref)

    zt = z_ref[...]
    tt = t_ref[...]
    if zt.dtype == jnp.float32:
        diff = zt - tt + EPS
    else:
        # Sub-32-bit inputs: subtract natively (2x elements per vreg op), single upcast.
        diff = (zt - tt).astype(jnp.float32) + EPS
    absdiff = jnp.abs(diff)                          # (tb, d) -- pure VPU

    row0 = i * tb

    def _accum(vals):
        # (tb, d) -> (tb//8, 8, d) is layout-preserving; axis-0 sum is sequential
        # per-vreg VALU adds into the resident (8, d) accumulator (no XLU here).
        acc_ref[...] += jnp.sum(vals.reshape(tb // _SUBLANE, _SUBLANE, d), axis=0)

    if b_true % tb == 0:
        # Static: every tile is full, no masking anywhere.
        _accum(absdiff)
    else:
        @pl.when(row0 + tb <= b_true)
        def _full_tile():
            _accum(absdiff)

        @pl.when(row0 + tb > b_true)
        def _tail_tile():
            # Boundary block: rows >= b_true hold unspecified data; select them away.
            rows = row0 + jax.lax.broadcasted_iota(jnp.int32, (tb, d), 0)
            _accum(jnp.where(rows < b_true, absdiff, 0.0))

    @pl.when(i == pl.num_programs(0) - 1)
    def _finalize():
        total_d = jnp.sum(acc_ref[...])              # one sublane + cross-lane fold
        # Splat into a lane-dense (8, 128) block -> unmasked vst, trivial writeback.
        out_ref[...] = jnp.full(out_ref.shape, total_d, dtype=out_ref.dtype)


def distance_prob_loss(z, logp, target_z, *, max_tile_rows=None):
    """z: (B, D), logp: (B,), target_z: (B, D) -> scalar f32 loss."""
    B, D = z.shape
    assert target_z.shape == (B, D) and logp.shape == (B,)

    itemsize = jnp.dtype(z.dtype).itemsize

    # Generation-aware VMEM sizing: half of physical (capped) as the scoped limit,
    # 3/4 of that as the budget for the 2 inputs x 2 pipeline buffers.
    vmem_limit = min(_vmem_capacity_bytes() // 2, 48 * 1024 * 1024)
    budget = (vmem_limit * 3) // 4

    tb = budget // (4 * D * itemsize)
    tb = max(_SUBLANE, (tb // _SUBLANE) * _SUBLANE)
    tb = min(tb, 4096)                               # amortizes ~0.35us/step; bounds tail waste
    if max_tile_rows is not None:
        tb = min(tb, max(_SUBLANE, (max_tile_rows // _SUBLANE) * _SUBLANE))
    tb = min(tb, _round_up(B, _SUBLANE))             # never bigger than one padded batch
    num_tiles = _cdiv(B, tb)

    kernel = functools.partial(_dpl_kernel, tb=tb, d=D, b_true=B)

    cost = pl.CostEstimate(
        flops=4 * B * D,
        transcendentals=0,
        bytes_accessed=2 * B * D * itemsize + _SUBLANE * _LANE * 4,
    )

    partial = pl.pallas_call(
        kernel,
        out_shape=jax.ShapeDtypeStruct((_SUBLANE, _LANE), jnp.float32),
        grid_spec=pltpu.PrefetchScalarGridSpec(
            num_scalar_prefetch=0,
            grid=(num_tiles,),
            in_specs=[
                pl.BlockSpec((tb, D), lambda i: (i, 0)),   # z
                pl.BlockSpec((tb, D), lambda i: (i, 0)),   # target_z
            ],
            out_specs=pl.BlockSpec((_SUBLANE, _LANE), lambda i: (0, 0)),
            scratch_shapes=[
                pltpu.VMEM((_SUBLANE, D), jnp.float32),    # running |diff| partial
            ],
        ),
        compiler_params=pltpu.CompilerParams(
            dimension_semantics=("arbitrary",),
            vmem_limit_bytes=vmem_limit,
        ),
        cost_estimate=cost,
    )(z, target_z)

    total_d = partial[0, 0]
    total_lp = jnp.sum(logp.astype(jnp.float32))     # tiny; reduced by XLA in the wrapper
    return (WEIGHT * total_d - total_lp) / B


def _reference(z, logp, target_z):
    d = jnp.sum(jnp.abs(z.astype(jnp.float32) - target_z.astype(jnp.float32) + EPS), axis=-1)
    return jnp.mean(WEIGHT * d - logp.astype(jnp.float32))


if __name__ == "__main__":
    key = jax.random.PRNGKey(0)
    k1, k2, k3, k4, k5, k6, k7, k8, k9 = jax.random.split(key, 9)

    # Case 1: single tile, no masking. batch=8, hidden=128.
    B, D = 8, 128
    z = jax.random.normal(k1, (B, D), dtype=jnp.float32)
    target_z = jax.random.normal(k2, (B, D), dtype=jnp.float32)
    logp = jax.random.normal(k3, (B,), dtype=jnp.float32)

    loss = jax.block_until_ready(distance_prob_loss(z, logp, target_z))
    if bool(jnp.isnan(loss)):   # mirrors `if retval != retval: raise ValueError('NaN')`
        raise ValueError("NaN")
    ref = _reference(z, logp, target_z)
    assert jnp.allclose(loss, ref, rtol=1e-5, atol=1e-5), (loss, ref)

    # Case 2: force multi-tile streaming with a ragged tail (exercises the
    # pl.when-gated boundary mask) by capping the row tile at 64 rows.
    B2, D2 = 200, 128
    z2 = jax.random.normal(k4, (B2, D2), dtype=jnp.float32)
    t2 = jax.random.normal(k5, (B2, D2), dtype=jnp.float32)
    logp2 = jax.random.normal(k6, (B2,), dtype=jnp.float32)

    loss2 = jax.block_until_ready(distance_prob_loss(z2, logp2, t2, max_tile_rows=64))
    if bool(jnp.isnan(loss2)):
        raise ValueError("NaN")
    ref2 = _reference(z2, logp2, t2)
    assert jnp.allclose(loss2, ref2, rtol=1e-4, atol=1e-3), (loss2, ref2)

    # Case 3: bf16 inputs (native bf16 subtract + single upcast path).
    B3, D3 = 16, 128
    z3 = jax.random.normal(k7, (B3, D3), dtype=jnp.bfloat16)
    t3 = jax.random.normal(k8, (B3, D3), dtype=jnp.bfloat16)
    logp3 = jax.random.normal(k9, (B3,), dtype=jnp.float32)

    loss3 = jax.block_until_ready(distance_prob_loss(z3, logp3, t3))
    if bool(jnp.isnan(loss3)):
        raise ValueError("NaN")
    ref3 = _reference(z3, logp3, t3)
    assert jnp.allclose(loss3, ref3, rtol=5e-2, atol=5e-2), (loss3, ref3)

    print("KERNEL_OK")
</pallas_src>

<mosaic_0001>
module attributes {stable_mosaic.version = 11 : i64} {
  func.func @_dpl_kernel(%arg0: i32, %arg1: memref<8x128xf32, #tpu.memory_space<vmem>>, %arg2: memref<8x128xf32, #tpu.memory_space<vmem>>, %arg3: memref<8x128xf32, #tpu.memory_space<vmem>>, %arg4: memref<8x128xf32, #tpu.memory_space<vmem>>) attributes {dimension_semantics = [#tpu.dimension_semantics<arbitrary>], iteration_bounds = array<i64: 1>, scalar_prefetch = 0 : i64, scratch_operands = 1 : i64, tpu.core_type = #tpu.core_type<tc>, window_params = [{transform_indices = @transform_0, window_bounds = array<i64: 8, 128>}, {transform_indices = @transform_1, window_bounds = array<i64: 8, 128>}, {pipeline_mode = #tpu.pipeline_mode<synchronous>, transform_indices = @transform_2, window_bounds = array<i64: 8, 128>}]} {
    %c0_i32 = arith.constant 0 : i32
    %0 = arith.cmpi eq, %arg0, %c0_i32 : i32
    %1 = arith.extui %0 : i1 to i32
    %c0_i32_0 = arith.constant 0 : i32
    %2 = arith.cmpi ne, %1, %c0_i32_0 : i32
    scf.if %2 {
      %cst_11 = arith.constant 0.000000e+00 : f32
      %17 = vector.broadcast %cst_11 : f32 to vector<8x128xf32>
      %c0_12 = arith.constant 0 : index
      %c0_13 = arith.constant 0 : index
      %18 = vector.load %arg4[%c0_12, %c0_13] : memref<8x128xf32, #tpu.memory_space<vmem>>, vector<8x128xf32>
      tpu.vector_store %arg4[%c0_12, %c0_13], %17 {strides = array<i32>} : memref<8x128xf32, #tpu.memory_space<vmem>>, vector<8x128xf32>,
    } else {
    }
    %c0 = arith.constant 0 : index
    %c0_1 = arith.constant 0 : index
    %3 = vector.load %arg1[%c0, %c0_1] : memref<8x128xf32, #tpu.memory_space<vmem>>, vector<8x128xf32>
    %c0_2 = arith.constant 0 : index
    %c0_3 = arith.constant 0 : index
    %4 = vector.load %arg2[%c0_2, %c0_3] : memref<8x128xf32, #tpu.memory_space<vmem>>, vector<8x128xf32>
    %5 = arith.subf %3, %4 : vector<8x128xf32>
    %cst = arith.constant 9.99999997E-7 : f32
    %6 = vector.broadcast %cst : f32 to vector<8x128xf32>
    %7 = arith.addf %5, %6 : vector<8x128xf32>
    %8 = math.absf %7 : vector<8x128xf32>
    %c0_4 = arith.constant 0 : index
    %c0_5 = arith.constant 0 : index
    %9 = vector.load %arg4[%c0_4, %c0_5] : memref<8x128xf32, #tpu.memory_space<vmem>>, vector<8x128xf32>
    %10 = vector.shape_cast %8 : vector<8x128xf32> to vector<1x8x128xf32>
    %cst_6 = arith.constant dense<0.000000e+00> : vector<8x128xf32>
    %11 = vector.multi_reduction <add>, %10, %cst_6 [0] : vector<1x8x128xf32> to vector<8x128xf32>
    %12 = arith.addf %9, %11 : vector<8x128xf32>
    %c0_7 = arith.constant 0 : index
    %c0_8 = arith.constant 0 : index
    %13 = vector.load %arg4[%c0_7, %c0_8] : memref<8x128xf32, #tpu.memory_space<vmem>>, vector<8x128xf32>
    tpu.vector_store %arg4[%c0_7, %c0_8], %12 {strides = array<i32>} : memref<8x128xf32, #tpu.memory_space<vmem>>, vector<8x128xf32>,
    %c0_i32_9 = arith.constant 0 : i32
    %14 = arith.cmpi eq, %arg0, %c0_i32_9 : i32
    %15 = arith.extui %14 : i1 to i32
    %c0_i32_10 = arith.constant 0 : i32
    %16 = arith.cmpi ne, %15, %c0_i32_10 : i32
    scf.if %16 {
      %c0_11 = arith.constant 0 : index
      %c0_12 = arith.constant 0 : index
      %17 = vector.load %arg4[%c0_11, %c0_12] : memref<8x128xf32, #tpu.memory_space<vmem>>, vector<8x128xf32>
      %18 = vector.shape_cast %17 : vector<8x128xf32> to vector<1x8x128xf32>
      %cst_13 = arith.constant dense<0.000000e+00> : vector<1xf32>
      %19 = vector.multi_reduction <add>, %18, %cst_13 [1, 2] : vector<1x8x128xf32> to vector<1xf32>
      %20 = vector.shape_cast %19 : vector<1xf32> to vector<1x1x1xf32>
      %21 = vector.extract %20[0, 0, 0] : f32 from vector<1x1x1xf32>
      %22 = vector.broadcast %21 : f32 to vector<8x128xf32>
      %c0_14 = arith.constant 0 : index
      %c0_15 = arith.constant 0 : index
      %23 = vector.load %arg3[%c0_14, %c0_15] : memref<8x128xf32, #tpu.memory_space<vmem>>, vector<8x128xf32>
      tpu.vector_store %arg3[%c0_14, %c0_15], %22 {strides = array<i32>} : memref<8x128xf32, #tpu.memory_space<vmem>>, vector<8x128xf32>,
    } else {
    }
    return
  }
  func.func @transform_0(%arg0: i32) -> (i32, i32) {
    %c0_i32 = arith.constant 0 : i32
    %c0_i32_0 = arith.constant 0 : i32
    return %arg0, %c0_i32 : i32, i32
  }
  func.func @transform_1(%arg0: i32) -> (i32, i32) {
    %c0_i32 = arith.constant 0 : i32
    %c0_i32_0 = arith.constant 0 : i32
    return %arg0, %c0_i32 : i32, i32
  }
  func.func @transform_2(%arg0: i32) -> (i32, i32) {
    %c0_i32 = arith.constant 0 : i32
    %c0_i32_0 = arith.constant 0 : i32
    %c0_i32_1 = arith.constant 0 : i32
    return %c0_i32, %c0_i32_0 : i32, i32
  }
}

</mosaic_0001>

<bundles_post_ra>
// kernel: tpu_custom_call.1
= control target key start
LH: loop header
LB: loop body
LE: loop exit
PB: predicated region body
PF: predicated region fallthrough
CT: control target
= control target key end

     0   :  { %7 = vsyncpa [#allocation4], 0  ;;  %s179_s0 = inlined_call_operand.hbm [shape: f32[8,128], index: 0, kind: input, shape index: {}]   ;;  %s180_s1 = inlined_call_operand.hbm [shape: f32[8,128], index: 1, kind: input, shape index: {}]   ;;  %s181_s2 = inlined_call_operand.hbm [shape: f32[8,128], index: 2, kind: output, shape index: {}]  }
   0x1   :  { %8 = vsyncpa [#allocation7], 0 }
   0x2   :  { %9 = vsyncpa [#allocation5], 0  ;;  %s152_s9 = smov [#allocation3]   ;;  %s153_s11 = smov [#allocation6]  }
   0x3   :  { %s16_s10 = sshll.u32 %s152_s9, 4  ;;  %s26_s12 = sshll.u32 %s153_s11, 4  ;;  %s17_s10 = int_to_ptr.vmem [resolvable:$true] %s16_s10  ;;  %s27_s12 = int_to_ptr.vmem [resolvable:$true] %s26_s12 }
   0x4   :  { %s94_s13 = scalar_lea.vmem %s17_s10, 128  ;;  %p99_p1 = scmp.lt.s32.totalorder %s17_s10, %s17_s10 }
   0x5   :  { %p95_p0 = scmp.ne.s32.totalorder %s17_s10, %s94_s13  ;;  %p100_p2 = scmp.lt.s32.totalorder %s94_s13, %s94_s13 }
   0x7   :  { %p101_p3 = por %p100_p2, %p99_p1 }
   0x9   :  { %p102_p4 = pnand %p101_p3, %p95_p0 }
   0xb   :  { %105 = shalt.err (!%p102_p4)
}
   0xc   :  { %19 = dma.hbm_to_vmem [thread:$0]  %s179_s0, 128, %s17_s10, [#allocation4]  }
   0xd   :  { %s114_s16 = scalar_lea.vmem %s27_s12, 128  ;;  %p119_p6 = scmp.lt.s32.totalorder %s27_s12, %s27_s12 }
   0xe   :  { %p115_p5 = scmp.ne.s32.totalorder %s27_s12, %s114_s16  ;;  %p120_p7 = scmp.lt.s32.totalorder %s114_s16, %s114_s16 }
  0x10   :  { %p121_p8 = por %p120_p7, %p119_p6 }
  0x12   :  { %p122_p9 = pnand %p121_p8, %p115_p5 }
  0x14   :  { %125 = shalt.err (!%p122_p9)
}
  0x15   :  { %29 = dma.hbm_to_vmem [thread:$0]  %s180_s1, 128, %s27_s12, [#allocation7]  }
  0x16   :  { %146 = dma.done.wait [#allocation4], 128  }
  0x17   :  { %147 = vsyncadd [#allocation4], 4294967168 }
  0x18   :  { %148 = dma.done.wait [#allocation7], 128  }
  0x19   :  { %149 = vsyncadd [#allocation7], 4294967168  ;;  %v41_v0 = vld [vmem:[#allocation3] sm:$0xff]  ;;  %v42_v1 = vld [vmem:[#allocation6] sm:$0xff]  ;;  %s154_s0 = smov [#allocation8]  }
  0x1a   :  { %v43_v2 = vsub.f32 %v41_v0, %v42_v1  ;;  %s71_s1 = sshll.u32 %s154_s0, 4  ;;  %s72_s1 = int_to_ptr.vmem [resolvable:$true] %s71_s1 }
  0x1b   :  { %s126_s20 = scalar_lea.vmem %s72_s1, 128  ;;  %p131_p11 = scmp.lt.s32.totalorder %s72_s1, %s72_s1 }
  0x1c   :  { %v44_v3 = vadd.f32 1e-06, %v43_v2  ;;  %p127_p10 = scmp.ne.s32.totalorder %s72_s1, %s126_s20  ;;  %p132_p12 = scmp.lt.s32.totalorder %s126_s20, %s126_s20 }
  0x1e   :  { %v45_v4 = vand.u32 2147483647, %v44_v3  ;;  %p133_p13 = por %p132_p12, %p131_p11 }
  0x20   :  { %54 = vadd.xlane.f32.xlu0 %v45_v4  ;;  %p134_p0 = pnand %p133_p13, %p127_p10 }
  0xa9   :  { %v55_v5 = vpop.xlane.xlu0 %54 }
  0xaa   :  { %v56_v6 = vrot.slane %v55_v5, 4 }
  0xac   :  { %v57_v7 = vadd.f32 %v56_v6, %v55_v5 }
  0xae   :  { %v58_v8 = vrot.slane %v57_v7, 2 }
  0xb0   :  { %v59_v9 = vadd.f32 %v58_v8, %v57_v7 }
  0xb2   :  { %v60_v10 = vrot.slane %v59_v9, 1 }
  0xb4   :  { %v61_v11 = vadd.f32 %v60_v10, %v59_v9 }
  0xb6   :  { %81 = vpush %v61_v11 }
  0xe7   :  { %s82_s19 = spop %81 }
  0xe8   :  { %v63_v12 = vstv %s82_s19 }
  0xe9   :  { %64 = vst [vmem:[#allocation8] sm:$0xff] %v63_v12 }
  0xea   :  { %137 = shalt.err (!%p134_p0)
}
  0xeb   :  { %74 = dma.vmem_to_hbm [thread:$0]  %s72_s1, 128, %s181_s2, [#allocation5]  }
  0xec   :  { %150 = dma.done.wait [#allocation5], 128  }
  0xed   :  { %151 = vsyncadd [#allocation5], 4294967168 }
  0xee   :  { %78 = vsyncpa [#allocation4], 1 }
  0xef   :  { %79 = vsyncpa [#allocation7], 1 }
  0xf0   :  { %80 = vsyncpa [#allocation5], 1 }

</bundles_post_ra>
